<compile_context>
chip_gen: v6e
topology: v6e:2x2x1
jax: 0.10.0
libtpu: 0.0.40
codegen_flags: <defaults>
</compile_context>

<pallas_src>
import jax
import jax.numpy as jnp
from jax.experimental import pallas as pl
from jax.experimental.pallas import tpu as pltpu


def _make_conv_gap_head_kernel(batch, hw):
    """Fused conv3x3 + ReLU + GAP + selected-head kernel (single invocation).

    Ref shapes (all resident in VMEM):
      p_ref  : (K_pad, batch*hw)  bf16  im2col^T; row 9*Cin is the all-ones
                                        bias row, rows beyond it are zero.
      w_ref  : (Cout, K_pad)      bf16  conv weight (tap-major) + bias column,
                                        zero-padded along K.
      hw_ref : (Cout, NC_pad)     f32   selected head weight, pre-scaled 1/(H*W).
      hb_ref : (1, NC_pad)        f32   selected head bias (zero padded).
      out_ref: (batch, NC_pad)    f32   logits of the selected task.
    """

    def kernel(p_ref, w_ref, hw_ref, hb_ref, out_ref):
        # Whole conv (3x3, pad=1, bias folded) as ONE bf16 MXU pass, f32 accum.
        acc = jnp.dot(w_ref[...], p_ref[...],
                      preferred_element_type=jnp.float32)     # (Cout, batch*hw)
        acc = jnp.maximum(acc, 0.0)                            # ReLU, f32

        head_w = hw_ref[...]                                   # (Cout, NC_pad)
        rows = []
        for b in range(batch):                                 # static unroll
            # Global pool of image b: lane-segment sum (1/HW folded into head_w).
            pooled_b = jnp.sum(acc[:, b * hw:(b + 1) * hw],
                               axis=1, keepdims=True)          # (Cout, 1)
            # Head for image b: broadcast-mul + sublane reduce (no extra MXU).
            rows.append(jnp.sum(pooled_b * head_w,
                                axis=0, keepdims=True))        # (1, NC_pad)
        logits = jnp.concatenate(rows, axis=0) if batch > 1 else rows[0]
        out_ref[...] = logits + hb_ref[...]                    # (batch, NC_pad)

    return kernel


def task_specific_forward(x_nchw, params, task):
    """Equivalent of TaskSpecificModel(task, model)(x) = model(x)[task]."""
    conv_w, conv_b, head_w, head_b = params

    B, Cin, H, W = x_nchw.shape
    KH, KW, _, Cout = conv_w.shape
    T, _, NC = head_w.shape
    HW = H * W
    K = KH * KW * Cin + 1                        # +1 = folded conv bias row
    K_pad = 128 * pl.cdiv(K, 128)                # lane-dense contraction dim
    NC_pad = 128 * pl.cdiv(NC, 128)              # lane-dense output

    # NCHW (PyTorch) -> NHWC, spatial pad 1 (conv padding=1).
    x = jnp.transpose(x_nchw, (0, 2, 3, 1)).astype(jnp.float32)
    xp = jnp.pad(x, ((0, 0), (1, 1), (1, 1), (0, 0)))

    # Lane-dense im2col operand built in the wrapper (no in-kernel scratch):
    # tap-major (kh, kw, cin) columns matching conv_w.reshape(9*Cin, Cout),
    # plus a constant-1 bias column, zero-padded to K_pad, transposed so the
    # kernel sees (K_pad, B*HW) with M = B*HW on lanes.
    taps = [xp[:, kh:kh + H, kw:kw + W, :]
            for kh in range(KH) for kw in range(KW)]
    patches = jnp.concatenate(taps, axis=-1).reshape(B * HW, KH * KW * Cin)
    patches = jnp.concatenate(
        [patches, jnp.ones((B * HW, 1), patches.dtype)], axis=-1)        # bias col
    patches = jnp.pad(patches, ((0, 0), (0, K_pad - K)))                 # zero K pad
    p_t = jnp.transpose(patches).astype(jnp.bfloat16)                    # (K_pad, B*HW)

    # Conv weight (Cout, K_pad): tap-major + bias column, zero-padded K rows.
    w = conv_w.reshape(KH * KW * Cin, Cout)
    w = jnp.concatenate([w, conv_b.reshape(1, Cout)], axis=0)            # (K, Cout)
    w_t = jnp.pad(jnp.transpose(w),
                  ((0, 0), (0, K_pad - K))).astype(jnp.bfloat16)         # (Cout, K_pad)

    # TaskSpecificModel keeps only model(x)[task]: slice that head up front,
    # fold the 1/(H*W) pooling scale into it, pad NC to 128 lanes (epilogue
    # math stays f32 — v5e-friendly, well within tolerance).
    hw_sel = jnp.pad((head_w[task] / float(HW)).astype(jnp.float32),
                     ((0, 0), (0, NC_pad - NC)))                         # (Cout, NC_pad)
    hb_sel = jnp.pad(head_b[task].reshape(1, NC).astype(jnp.float32),
                     ((0, 0), (0, NC_pad - NC)))                         # (1, NC_pad)

    out = pl.pallas_call(
        _make_conv_gap_head_kernel(B, HW),
        out_shape=jax.ShapeDtypeStruct((B, NC_pad), jnp.float32),
        in_specs=[pl.BlockSpec(memory_space=pltpu.MemorySpace.VMEM)] * 4,
        out_specs=pl.BlockSpec(memory_space=pltpu.MemorySpace.VMEM),
    )(p_t, w_t, hw_sel, hb_sel)

    # Strip lane padding; x[task] selection already happened via head slicing.
    return out[:, :NC]


def reference_forward(x_nchw, params, task):
    """Plain-JAX f32 reference of the synthetic multi-task model + x[task]."""
    conv_w, conv_b, head_w, head_b = params
    x = jnp.transpose(x_nchw, (0, 2, 3, 1)).astype(jnp.float32)
    xp = jnp.pad(x, ((0, 0), (1, 1), (1, 1), (0, 0)))
    B, Hp, Wp, Cin = xp.shape
    H, W = Hp - 2, Wp - 2
    Cout = conv_w.shape[-1]
    acc = jnp.zeros((B, H, W, Cout), jnp.float32)
    for kh in range(3):
        for kw in range(3):
            acc = acc + jnp.einsum('bhwc,cd->bhwd',
                                   xp[:, kh:kh + H, kw:kw + W, :], conv_w[kh, kw])
    acc = jnp.maximum(acc + conv_b.reshape(1, 1, 1, Cout), 0.0)
    pooled = acc.mean(axis=(1, 2))
    all_logits = tuple(pooled @ head_w[t] + head_b[t]
                       for t in range(head_w.shape[0]))
    return all_logits[task]


if __name__ == "__main__":
    key = jax.random.PRNGKey(0)
    kx, kw, kb, khw, khb = jax.random.split(key, 5)

    # Small shapes consistent with a conv-net multi-task forward.
    B, Cin, H, W = 2, 4, 16, 16
    Cout, T, NC = 8, 2, 10      # T tasks, NC classes per task
    task = 1

    x = jax.random.normal(kx, (B, Cin, H, W), dtype=jnp.float32)

    # Deterministic synthetic parameters (no checkpoint loading).
    conv_w = jax.random.normal(kw, (3, 3, Cin, Cout), dtype=jnp.float32) * 0.1
    conv_b = jax.random.normal(kb, (1, Cout), dtype=jnp.float32) * 0.1
    head_w = jax.random.normal(khw, (T, Cout, NC), dtype=jnp.float32) * 0.1
    head_b = jax.random.normal(khb, (T, NC), dtype=jnp.float32) * 0.1

    params = (conv_w, conv_b, head_w, head_b)

    out = task_specific_forward(x, params, task)
    jax.block_until_ready(out)
    assert out.shape == (B, NC)

    ref = reference_forward(x, params, task)
    max_err = float(jnp.max(jnp.abs(out - ref)))
    assert max_err < 5e-2, f"max abs err {max_err}"

    print("KERNEL_OK")
</pallas_src>

<mosaic_0001>
module attributes {stable_mosaic.version = 11 : i64} {
  func.func @kernel(%arg0: memref<128x512xbf16, #tpu.memory_space<vmem>>, %arg1: memref<8x128xbf16, #tpu.memory_space<vmem>>, %arg2: memref<8x128xf32, #tpu.memory_space<vmem>>, %arg3: memref<1x128xf32, #tpu.memory_space<vmem>>, %arg4: memref<2x128xf32, #tpu.memory_space<vmem>>) attributes {dimension_semantics = [], scalar_prefetch = 0 : i64, scratch_operands = 0 : i64, tpu.core_type = #tpu.core_type<tc>} {
    %c0 = arith.constant 0 : index
    %c0_0 = arith.constant 0 : index
    %0 = vector.load %arg1[%c0, %c0_0] : memref<8x128xbf16, #tpu.memory_space<vmem>>, vector<8x128xbf16>
    %c0_1 = arith.constant 0 : index
    %c0_2 = arith.constant 0 : index
    %1 = vector.load %arg0[%c0_1, %c0_2] : memref<128x512xbf16, #tpu.memory_space<vmem>>, vector<128x512xbf16>
    %cst = arith.constant dense<0.000000e+00> : vector<8x512xf32>
    %2 = tpu.matmul %0, %1, %cst {dimension_numbers = #tpu.dot_dimension_numbers<[1], [0], [0], [1], [0, 0, 1, 1], [], []>} : vector<8x128xbf16>, vector<128x512xbf16>, vector<8x512xf32> -> vector<8x512xf32>
    %cst_3 = arith.constant 0.000000e+00 : f32
    %3 = vector.broadcast %cst_3 : f32 to vector<8x512xf32>
    %4 = arith.maximumf %2, %3 : vector<8x512xf32>
    %c0_4 = arith.constant 0 : index
    %c0_5 = arith.constant 0 : index
    %5 = vector.load %arg2[%c0_4, %c0_5] : memref<8x128xf32, #tpu.memory_space<vmem>>, vector<8x128xf32>
    %6 = vector.extract_strided_slice %4 {offsets = [0, 0], sizes = [8, 256], strides = [1, 1]} : vector<8x512xf32> to vector<8x256xf32>
    %cst_6 = arith.constant dense<0.000000e+00> : vector<8xf32>
    %7 = vector.multi_reduction <add>, %6, %cst_6 [1] : vector<8x256xf32> to vector<8xf32>
    %8 = vector.shape_cast %7 : vector<8xf32> to vector<8x1xf32>
    %9 = vector.broadcast %8 : vector<8x1xf32> to vector<8x128xf32>
    %10 = arith.mulf %9, %5 : vector<8x128xf32>
    %cst_7 = arith.constant dense<0.000000e+00> : vector<128xf32>
    %11 = vector.multi_reduction <add>, %10, %cst_7 [0] : vector<8x128xf32> to vector<128xf32>
    %12 = vector.shape_cast %11 : vector<128xf32> to vector<1x128xf32>
    %13 = vector.extract_strided_slice %4 {offsets = [0, 256], sizes = [8, 256], strides = [1, 1]} : vector<8x512xf32> to vector<8x256xf32>
    %cst_8 = arith.constant dense<0.000000e+00> : vector<8xf32>
    %14 = vector.multi_reduction <add>, %13, %cst_8 [1] : vector<8x256xf32> to vector<8xf32>
    %15 = vector.shape_cast %14 : vector<8xf32> to vector<8x1xf32>
    %16 = vector.broadcast %15 : vector<8x1xf32> to vector<8x128xf32>
    %17 = arith.mulf %16, %5 : vector<8x128xf32>
    %cst_9 = arith.constant dense<0.000000e+00> : vector<128xf32>
    %18 = vector.multi_reduction <add>, %17, %cst_9 [0] : vector<8x128xf32> to vector<128xf32>
    %19 = vector.shape_cast %18 : vector<128xf32> to vector<1x128xf32>
    %20 = tpu.concatenate %12, %19 in 0 : vector<1x128xf32>, vector<1x128xf32> -> vector<2x128xf32>
    %c0_10 = arith.constant 0 : index
    %c0_11 = arith.constant 0 : index
    %21 = vector.load %arg3[%c0_10, %c0_11] : memref<1x128xf32, #tpu.memory_space<vmem>>, vector<1x128xf32>
    %22 = vector.broadcast %21 : vector<1x128xf32> to vector<2x128xf32>
    %23 = arith.addf %20, %22 : vector<2x128xf32>
    %c0_12 = arith.constant 0 : index
    %c0_13 = arith.constant 0 : index
    %24 = vector.load %arg4[%c0_12, %c0_13] : memref<2x128xf32, #tpu.memory_space<vmem>>, vector<2x128xf32>
    tpu.vector_store %arg4[%c0_12, %c0_13], %23 {strides = array<i32>} : memref<2x128xf32, #tpu.memory_space<vmem>>, vector<2x128xf32>,
    return
  }
}

</mosaic_0001>

<bundles_post_ra>
// kernel: tpu_custom_call.1
= control target key start
LH: loop header
LB: loop body
LE: loop exit
PB: predicated region body
PF: predicated region fallthrough
CT: control target
= control target key end

     0   :  { %9 = vsyncpa [#allocation3], 0  ;;  %s604_s0 = inlined_call_operand.hbm [shape: bf16[128,512], index: 0, kind: input, shape index: {}]   ;;  %s605_s1 = inlined_call_operand.hbm [shape: bf16[8,128], index: 1, kind: input, shape index: {}]   ;;  %s606_s2 = inlined_call_operand.hbm [shape: f32[8,128], index: 2, kind: input, shape index: {}]   ;;  %s607_s3 = inlined_call_operand.vmem [shape: f32[1,128], index: 3, kind: input, shape index: {}]   ;;  %s608_s4 = inlined_call_operand.hbm [shape: f32[2,128], index: 4, kind: output, shape index: {}]  }
   0x1   :  { %10 = vsyncpa [#allocation6], 0 }
   0x2   :  { %11 = vsyncpa [#allocation4], 0  ;;  %s557_s15 = smov [#allocation5]   ;;  %s558_s17 = smov [#allocation2]  }
   0x3   :  { %s30_s16 = sshll.u32 %s557_s15, 4  ;;  %s17_s18 = sshll.u32 %s558_s17, 4  ;;  %s31_s16 = int_to_ptr.vmem [resolvable:$true] %s30_s16  ;;  %s18_s18 = int_to_ptr.vmem [resolvable:$true] %s17_s18 }
   0x4   :  { %s479_s19 = scalar_lea.vmem %s31_s16, 64  ;;  %p484_p1 = scmp.lt.s32.totalorder %s31_s16, %s31_s16 }
   0x5   :  { %p480_p0 = scmp.ne.s32.totalorder %s31_s16, %s479_s19  ;;  %p485_p2 = scmp.lt.s32.totalorder %s479_s19, %s479_s19 }
   0x7   :  { %p486_p3 = por %p485_p2, %p484_p1 }
   0x9   :  { %p487_p4 = pnand %p486_p3, %p480_p0 }
   0xb   :  { %490 = shalt.err (!%p487_p4)
}
   0xc   :  { %33 = dma.hbm_to_vmem [thread:$0]  %s605_s1, 64, %s31_s16, [#allocation6]  }
   0xd   :  { %s499_s22 = scalar_lea.vmem %s18_s18, 4096  ;;  %p504_p6 = scmp.lt.s32.totalorder %s18_s18, %s18_s18 }
   0xe   :  { %p500_p5 = scmp.ne.s32.totalorder %s18_s18, %s499_s22  ;;  %p505_p7 = scmp.lt.s32.totalorder %s499_s22, %s499_s22 }
  0x10   :  { %p506_p8 = por %p505_p7, %p504_p6 }
  0x12   :  { %p507_p9 = pnand %p506_p8, %p500_p5 }
  0x14   :  { %510 = shalt.err (!%p507_p9)
}
  0x15   :  { %s559_s23 = smov 256   ;;  %s560_s24 = smov 16  }
  0x16   :  { %23 = dma.hbm_to_vmem [thread:$0]  %s604_s0, 4096, %s18_s18, [#allocation3], %s559_s23, %s559_s23, %s560_s24  }
  0x17   :  { %s561_s27 = smov [#allocation7]  }
  0x18   :  { %s40_s28 = sshll.u32 %s561_s27, 4  ;;  %s41_s28 = int_to_ptr.vmem [resolvable:$true] %s40_s28 }
  0x19   :  { %s519_s29 = scalar_lea.vmem %s41_s28, 128  ;;  %p524_p11 = scmp.lt.s32.totalorder %s41_s28, %s41_s28 }
  0x1a   :  { %p520_p10 = scmp.ne.s32.totalorder %s41_s28, %s519_s29  ;;  %p525_p12 = scmp.lt.s32.totalorder %s519_s29, %s519_s29 }
  0x1c   :  { %p526_p13 = por %p525_p12, %p524_p11 }
  0x1e   :  { %p527_p0 = pnand %p526_p13, %p520_p10 }
  0x20   :  { %530 = shalt.err (!%p527_p0)
}
  0x21   :  { %43 = dma.hbm_to_vmem [thread:$0]  %s606_s2, 128, %s41_s28, [#allocation6]  }
  0x22   :  { %551 = dma.done.wait [#allocation3], 4096  }
  0x23   :  { %552 = vsyncadd [#allocation3], 4294963200 }
  0x24   :  { %553 = dma.done.wait [#allocation6], 192  }
  0x25   :  { %554 = vsyncadd [#allocation6], 4294967104  ;;  %v562_v0 = vmov 0   ;;  %v423_v1 = vld [vmem:[#allocation2 + $0xe4] ss:$16 sps:$4 sm:$0xff]   ;;  %vm356_vm0 = vcmask 1040384  }
  0x26   :  { %281 = vmatprep.mubr.bf16.mxu0 %v562_v0  ;;  %322 = vmatprep.mubr.bf16.mxu1 %v562_v0  ;;  %v425_v2 = vld [vmem:[#allocation2 + $0xec] ss:$16 sps:$4 sm:$0xff]   ;;  %v427_v3 = vld [vmem:[#allocation2 + $0xe0] ss:$16 sps:$4 sm:$0xff]   ;;  %v428_v4 = vld [vmem:[#allocation2 + $0xe8] ss:$16 sps:$4 sm:$0xff]  }
  0x27   :  { %249 = vmatprep.subr.bf16.mxu0 %v423_v1  ;;  %290 = vmatprep.subr.bf16.mxu1 %v425_v2  ;;  %v429_v5 = vld [vmem:[#allocation2 + $0xc4] ss:$16 sps:$4 sm:$0xff]   ;;  %v431_v6 = vld [vmem:[#allocation2 + $0xcc] ss:$16 sps:$4 sm:$0xff]   ;;  %v433_v7 = vld [vmem:[#allocation2 + $0xc0] ss:$16 sps:$4 sm:$0xff]  }
  0x28   :  { %250 = vmatpush1.bf16.msra.mxu0 %v427_v3  ;;  %291 = vmatpush1.bf16.msra.mxu1 %v428_v4  ;;  %v434_v8 = vld [vmem:[#allocation2 + $0xc8] ss:$16 sps:$4 sm:$0xff]   ;;  %v435_v9 = vld [vmem:[#allocation2 + $0xa4] ss:$16 sps:$4 sm:$0xff]   ;;  %v437_v10 = vld [vmem:[#allocation2 + $0xac] ss:$16 sps:$4 sm:$0xff]  }
  0x29   :  { %251 = vmatprep.subr.bf16.mxu0 %v429_v5  ;;  %292 = vmatprep.subr.bf16.mxu1 %v431_v6  ;;  %v439_v11 = vld [vmem:[#allocation2 + $0xa0] ss:$16 sps:$4 sm:$0xff]   ;;  %v440_v12 = vld [vmem:[#allocation2 + $0xa8] ss:$16 sps:$4 sm:$0xff]   ;;  %v441_v13 = vld [vmem:[#allocation2 + $0x84] ss:$16 sps:$4 sm:$0xff]  }
  0x2a   :  { %v443_v14 = vld [vmem:[#allocation2 + $0x8c] ss:$16 sps:$4 sm:$0xff]   ;;  %v445_v15 = vld [vmem:[#allocation2 + $0x80] ss:$16 sps:$4 sm:$0xff]   ;;  %v446_v16 = vld [vmem:[#allocation2 + $0x88] ss:$16 sps:$4 sm:$0xff]  }
  0x2b   :  { %v447_v17 = vld [vmem:[#allocation2 + $0x64] ss:$16 sps:$4 sm:$0xff]   ;;  %v449_v18 = vld [vmem:[#allocation2 + $0x6c] ss:$16 sps:$4 sm:$0xff]   ;;  %v451_v19 = vld [vmem:[#allocation2 + $0x60] ss:$16 sps:$4 sm:$0xff]  }
  0x2c   :  { %252 = vmatpush1.bf16.msra.mxu0 %v433_v7  ;;  %293 = vmatpush1.bf16.msra.mxu1 %v434_v8  ;;  %v452_v20 = vld [vmem:[#allocation2 + $0x68] ss:$16 sps:$4 sm:$0xff]   ;;  %v453_v21 = vld [vmem:[#allocation2 + $0x44] ss:$16 sps:$4 sm:$0xff]   ;;  %v455_v22 = vld [vmem:[#allocation2 + $0x4c] ss:$16 sps:$4 sm:$0xff]  }
  0x2d   :  { %253 = vmatprep.subr.bf16.mxu0 %v435_v9  ;;  %294 = vmatprep.subr.bf16.mxu1 %v437_v10  ;;  %v457_v23 = vld [vmem:[#allocation2 + $0x40] ss:$16 sps:$4 sm:$0xff]   ;;  %v458_v24 = vld [vmem:[#allocation2 + $0x48] ss:$16 sps:$4 sm:$0xff]   ;;  %v459_v25 = vld [vmem:[#allocation2 + $0x24] ss:$16 sps:$4 sm:$0xff]  }
  0x2e   :  { %v461_v26 = vld [vmem:[#allocation2 + $0x2c] ss:$16 sps:$4 sm:$0xff]   ;;  %v463_v27 = vld [vmem:[#allocation2 + $0x20] ss:$16 sps:$4 sm:$0xff]   ;;  %v464_v28 = vld [vmem:[#allocation2 + $0x28] ss:$16 sps:$4 sm:$0xff]  }
  0x2f   :  { %v465_v29 = vld [vmem:[#allocation2 + $0x4] ss:$16 sps:$4 sm:$0xff]   ;;  %v467_v30 = vld [vmem:[#allocation2 + $0xc] ss:$16 sps:$4 sm:$0xff]   ;;  %v469_v31 = vld [vmem:[#allocation2] ss:$16 sps:$4 sm:$0xff]  }
  0x30   :  { %254 = vmatpush1.bf16.msra.mxu0 %v439_v11  ;;  %295 = vmatpush1.bf16.msra.mxu1 %v440_v12  ;;  %v470_v32 = vld [vmem:[#allocation2 + $0x8] ss:$16 sps:$4 sm:$0xff]   ;;  %v56_v33 = vld [vmem:[#allocation5] sm:$0xf]  ;;  %s563_s5 = smov [#allocation8]  }
  0x31   :  { %255 = vmatprep.subr.bf16.mxu0 %v441_v13  ;;  %296 = vmatprep.subr.bf16.mxu1 %v443_v14  ;;  %v335_v48 = vld [vmem:[#allocation7] sm:$0xff]  ;;  %v415_v1 = vld [vmem:[%s607_s3] ss:$0 sm:$0xff]  ;;  %s373_s6 = sshll.u32 %s563_s5, 4  ;;  %s374_s6 = int_to_ptr.vmem [resolvable:$true] %s373_s6 }
  0x32   :  { %s531_s7 = scalar_lea.vmem %s374_s6, 32  ;;  %p536_p2 = scmp.lt.s32.totalorder %s374_s6, %s374_s6 }
  0x33   :  { %p532_p1 = scmp.ne.s32.totalorder %s374_s6, %s531_s7  ;;  %p537_p3 = scmp.lt.s32.totalorder %s531_s7, %s531_s7 }
  0x34   :  { %256 = vmatpush1.bf16.msra.mxu0 %v445_v15  ;;  %297 = vmatpush1.bf16.msra.mxu1 %v446_v16 }
  0x35   :  { %257 = vmatprep.subr.bf16.mxu0 %v447_v17  ;;  %298 = vmatprep.subr.bf16.mxu1 %v449_v18  ;;  %p538_p4 = por %p537_p3, %p536_p2 }
  0x37   :  { %p539_p5 = pnand %p538_p4, %p532_p1 }
  0x38   :  { %258 = vmatpush1.bf16.msra.mxu0 %v451_v19  ;;  %299 = vmatpush1.bf16.msra.mxu1 %v452_v20 }
  0x39   :  { %259 = vmatprep.subr.bf16.mxu0 %v453_v21  ;;  %300 = vmatprep.subr.bf16.mxu1 %v455_v22 }
  0x3c   :  { %260 = vmatpush1.bf16.msra.mxu0 %v457_v23  ;;  %301 = vmatpush1.bf16.msra.mxu1 %v458_v24 }
  0x3d   :  { %261 = vmatprep.subr.bf16.mxu0 %v459_v25  ;;  %302 = vmatprep.subr.bf16.mxu1 %v461_v26 }
  0x40   :  { %262 = vmatpush1.bf16.msra.mxu0 %v463_v27  ;;  %303 = vmatpush1.bf16.msra.mxu1 %v464_v28 }
  0x41   :  { %263 = vmatprep.subr.bf16.mxu0 %v465_v29  ;;  %304 = vmatprep.subr.bf16.mxu1 %v467_v30 }
  0x44   :  { %264 = vmatpush1.bf16.msra.mxu0 %v469_v31  ;;  %305 = vmatpush1.bf16.msra.mxu1 %v470_v32 }
  0x47   :  { %282 = vmatmul.mubr.bf16.vlgmr.msra.gmra.mxu0 %v56_v33  ;;  %323 = vmatmul.mubr.bf16.vlgmr.msra.gmra.mxu1 %v56_v33 }
 0x107   :  { %v283_v34 = vpop.f32.mrf.mxu0  ;;  %v324_v35 = vpop.f32.mrf.mxu1 }
 0x108   :  { %v331_v38 = vmax.f32 %v283_v34, 0.0  ;;  %v333_v42 = vmax.f32 %v324_v35, 0.0 }
 0x109   :  { %v285_v36 = vpop.f32.mrf.mxu0  ;;  %v326_v37 = vpop.f32.mrf.mxu1 }
 0x10a   :  { %v332_v39 = vmax.f32 %v285_v36, 0.0  ;;  %v334_v43 = vmax.f32 %v326_v37, 0.0 }
 0x10b   :  { %v287_v40 = vpop.f32.mrf.mxu0  ;;  %v328_v41 = vpop.f32.mrf.mxu1 }
 0x10c   :  { %v336_v44 = vadd.f32 %v332_v39, %v331_v38  ;;  %v346_v47 = vadd.f32 %v334_v43, %v333_v42 }
 0x10d   :  { %v288_v45 = vpop.f32.mrf.mxu0  ;;  %v329_v46 = vpop.f32.mrf.mxu1 }
 0x10e   :  { %337 = vadd.xlane.f32.xlu0 %v336_v44 }
 0x112   :  { %347 = vadd.xlane.f32.xlu0 %v346_v47 }
 0x197   :  { %v338_v49 = vpop.xlane.xlu0 %337 }
 0x198   :  { %v339_v50 = vmul.f32 %v338_v49, %v335_v48 }
 0x19a   :  { %v340_v51 = vrot.slane %v339_v50, 4 }
 0x19b   :  { %v348_v52 = vpop.xlane.xlu0 %347 }
 0x19c   :  { %v341_v53 = vadd.f32 %v340_v51, %v339_v50  ;;  %v349_v54 = vmul.f32 %v348_v52, %v335_v48 }
 0x19e   :  { %v342_v55 = vrot.slane %v341_v53, 2  ;;  %v350_v56 = vrot.slane %v349_v54, 4 }
 0x1a0   :  { %v343_v57 = vadd.f32 %v342_v55, %v341_v53  ;;  %v351_v58 = vadd.f32 %v350_v56, %v349_v54 }
 0x1a2   :  { %v352_v59 = vrot.slane %v351_v58, 2  ;;  %v344_v60 = vrot.slane %v343_v57, 1 }
 0x1a4   :  { %v353_v61 = vadd.f32 %v352_v59, %v351_v58  ;;  %v345_v63 = vadd.f32 %v344_v60, %v343_v57 }
 0x1a6   :  { %v354_v62 = vrot.slane %v353_v61, 1 }
 0x1a8   :  { %v355_v0 = vadd.f32 %v354_v62, %v353_v61 }
 0x1aa   :  { %v357_v2 = vsel %vm356_vm0, %v345_v63, %v355_v0 }
 0x1ab   :  { %v365_v3 = vadd.f32 %v415_v1, %v357_v2 }
 0x1ad   :  { %366 = vst [vmem:[#allocation8] sm:$0x3] %v365_v3 }
 0x1ae   :  { %542 = shalt.err (!%p539_p5)
}
 0x1af   :  { %376 = dma.vmem_to_hbm [thread:$0]  %s374_s6, 32, %s608_s4, [#allocation4]  }
 0x1b0   :  { %555 = dma.done.wait [#allocation4], 32  }
 0x1b1   :  { %556 = vsyncadd [#allocation4], 4294967264 }
 0x1b2   :  { %380 = vsyncpa [#allocation3], 1 }
 0x1b3   :  { %381 = vsyncpa [#allocation6], 1 }
 0x1b4   :  { %382 = vsyncpa [#allocation4], 1 }

</bundles_post_ra>
